<compile_context>
chip_gen: v7x
topology: tpu7x:2x2x1
jax: 0.10.0
libtpu: 0.0.40
codegen_flags: <defaults>
</compile_context>

<pallas_src>
import jax
import jax.numpy as jnp
from jax.experimental import pallas as pl
from jax.experimental.pallas import tpu as pltpu

# ---- small, deterministic synthetic config ----------------------------------
B = 2                              # batch (crops)
C_IN = 4                           # input channels
IMG = 16                           # spatial size (IMG x IMG)
PATCH = 4                          # patch size -> 16 tokens per image
N_TOK = (IMG // PATCH) ** 2
D_PATCH = C_IN * PATCH * PATCH     # 64
D_FLAT = C_IN * IMG * IMG          # 1024
HIDDEN = 32
NUM_CLASSES = 8
OUT_LANES = 128                    # packed lane-dense output: [cls | pooler | zero-pad]
assert NUM_CLASSES + HIDDEN <= OUT_LANES


def _round_up(n, m):
    return ((n + m - 1) // m) * m


def _fused_kernel(x_ref, w1_ref, b1_ref, w2_ref, b2_ref, out_ref):
    # x may already be bf16 (producer-fused epilogue); otherwise cast on the VPU.
    x = x_ref[...]
    if x.dtype != jnp.bfloat16:
        x = x.astype(jnp.bfloat16)
    # im2col + patch-embed + token mean-pool + pooler dense, all folded into W1:
    # one [bm,1024] x [1024,32] bf16 matmul, f32 accumulation; bias + tanh in f32.
    pooler = jnp.tanh(
        jnp.dot(x, w1_ref[...], preferred_element_type=jnp.float32) + b1_ref[...])
    # Head logits + exact f32 pooler passthrough + lane padding folded into W2 (f32):
    # lanes [0:8] = cls, [8:40] = pooler, rest 0. Single unmasked 128-lane store.
    out_ref[...] = (
        jnp.dot(pooler, w2_ref[...], preferred_element_type=jnp.float32)
        + b2_ref[...]).astype(out_ref.dtype)


def init_params(key):
    """Raw module parameters (f32), PyTorch-equivalent."""
    k1, k2, k3 = jax.random.split(key, 3)
    w_emb = jax.random.normal(k1, (D_PATCH, HIDDEN), jnp.float32) * 0.02
    b_emb = jnp.zeros((1, HIDDEN), jnp.float32)
    w_pool = jax.random.normal(k2, (HIDDEN, HIDDEN), jnp.float32) * 0.02
    b_pool = jnp.zeros((1, HIDDEN), jnp.float32)
    w_head = jax.random.normal(k3, (HIDDEN, NUM_CLASSES), jnp.float32) * 0.02
    b_head = jnp.zeros((1, NUM_CLASSES), jnp.float32)
    return (w_emb, b_emb, w_pool, b_pool, w_head, b_head)


def fold_params(params):
    """One-time parameter prep (not per-call glue).

    - Fold im2col + token mean-pool into the patch-embed weight (w_eff), then fold
      the pooler dense into it:  W1 = w_eff @ w_pool,  b1 = b_emb @ w_pool + b_pool.
      Fold in f32, cast W1 to bf16 for the MXU.
    - Fold the linear head, an exact pooler passthrough, and lane padding into one
      f32 (HIDDEN, 128) matrix W2 / bias b2 so the kernel writes a single
      lane-dense output slab.
    """
    w_emb, b_emb, w_pool, b_pool, w_head, b_head = params
    nh = nw = IMG // PATCH
    w_r = w_emb.reshape(C_IN, PATCH, PATCH, HIDDEN)
    # w_eff[c, i, j, h] = w_emb[c, i % P, j % P, h] / N_TOK  (tile == modular index)
    w_eff = jnp.tile(w_r, (1, nh, nw, 1)).reshape(D_FLAT, HIDDEN) / float(N_TOK)
    w1 = w_eff @ w_pool                           # (D_FLAT, HIDDEN), f32 fold
    b1 = b_emb @ w_pool + b_pool                  # (1, HIDDEN), f32

    w2 = jnp.zeros((HIDDEN, OUT_LANES), jnp.float32)
    w2 = w2.at[:, :NUM_CLASSES].set(w_head)
    w2 = w2.at[:, NUM_CLASSES:NUM_CLASSES + HIDDEN].set(
        jnp.eye(HIDDEN, dtype=jnp.float32))
    b2 = jnp.zeros((1, OUT_LANES), jnp.float32).at[:, :NUM_CLASSES].set(b_head)

    return (w1.astype(jnp.bfloat16), b1.astype(jnp.float32),
            w2, b2)


@jax.jit
def multicrop_wrapper_forward(x, folded_params):
    """x: [B, C_IN, IMG, IMG] (NCHW), f32 or bf16. Returns (cls_output, pooler_output)."""
    b = x.shape[0]
    # Row-major flatten of contiguous NCHW: free bitcast under jit (no im2col kernel).
    # NOTE: if an upstream op leaves x in a non-default layout this becomes a copy.
    x_flat = x.reshape(b, D_FLAT)

    w1, b1, w2, b2 = folded_params

    # Crop block: up to 128 rows/step (fills v5e's 128 MXU rows; fine on v6e/v7x and
    # trivially within any VMEM budget), and >=2 grid steps whenever b > 8 so the
    # "parallel" axis can shard crops across v7x's two TensorCores.
    bm = min(128, max(8, _round_up((b + 1) // 2, 8)))
    b_pad = _round_up(b, bm)
    if b_pad != b:
        x_flat = jnp.pad(x_flat, ((0, b_pad - b), (0, 0)))
    grid = (b_pad // bm,)

    rows = lambda i: (i, 0)           # per-crop-block rows
    rep = lambda i: (0, 0)            # grid-invariant (VMEM-resident weights)
    resident = pl.Buffered(1)         # no second pipeline buffer for invariant weights

    flops = 2 * b_pad * (D_FLAT * HIDDEN + HIDDEN * OUT_LANES)
    bytes_accessed = (b_pad * D_FLAT * x_flat.dtype.itemsize
                      + w1.size * w1.dtype.itemsize
                      + (b1.size + w2.size + b2.size) * 4
                      + b_pad * OUT_LANES * 4)

    packed = pl.pallas_call(
        _fused_kernel,
        out_shape=jax.ShapeDtypeStruct((b_pad, OUT_LANES), jnp.float32),
        grid=grid,
        in_specs=[
            pl.BlockSpec((bm, D_FLAT), rows),
            pl.BlockSpec((D_FLAT, HIDDEN), rep, pipeline_mode=resident),
            pl.BlockSpec((1, HIDDEN), rep, pipeline_mode=resident),
            pl.BlockSpec((HIDDEN, OUT_LANES), rep, pipeline_mode=resident),
            pl.BlockSpec((1, OUT_LANES), rep, pipeline_mode=resident),
        ],
        out_specs=pl.BlockSpec((bm, OUT_LANES), rows),
        compiler_params=pltpu.CompilerParams(
            dimension_semantics=("parallel",)),
        cost_estimate=pl.CostEstimate(
            flops=flops, transcendentals=b_pad * HIDDEN,
            bytes_accessed=bytes_accessed),
    )(x_flat, w1, b1, w2, b2)

    # Padded rows / padding lanes must never leak to callers.
    cls_output = packed[:b, :NUM_CLASSES]
    pooler_output = packed[:b, NUM_CLASSES:NUM_CLASSES + HIDDEN]
    return cls_output, pooler_output


if __name__ == "__main__":
    key = jax.random.PRNGKey(0)
    kx, kp = jax.random.split(key)
    x = jax.random.normal(kx, (B, C_IN, IMG, IMG), jnp.float32)  # NCHW like PyTorch
    params = init_params(kp)
    folded = fold_params(params)

    cls_output, pooler_output = multicrop_wrapper_forward(x, folded)
    jax.block_until_ready((cls_output, pooler_output))

    # Reference 1: original module path (im2col -> patch-embed -> mean-pool ->
    # tanh pooler -> head) in pure f32 -- validates module semantics / weight folds.
    w_emb, b_emb, w_pool, b_pool, w_head, b_head = params
    nh = nw = IMG // PATCH
    p = x.reshape(B, C_IN, nh, PATCH, nw, PATCH).transpose(0, 2, 4, 1, 3, 5)
    p = p.reshape(B * nh * nw, D_PATCH)
    toks = p @ w_emb + b_emb
    pooled_f32 = toks.reshape(B, N_TOK, HIDDEN).mean(axis=1)
    pooler_f32 = jnp.tanh(pooled_f32 @ w_pool + b_pool)
    cls_f32 = pooler_f32 @ w_head + b_head
    assert jnp.allclose(pooler_output, pooler_f32, atol=5e-3)
    assert jnp.allclose(cls_output, cls_f32, atol=5e-3)

    # Reference 2: mirror of the folded kernel path (bf16 W1 matmul w/ f32 accum,
    # f32 packed head matmul) -- tight check of the kernel itself.
    w1_bf, b1_f, w2_f, b2_f = folded
    x_bf = x.reshape(B, D_FLAT).astype(jnp.bfloat16)
    pooler_r = jnp.tanh(jnp.dot(x_bf, w1_bf, preferred_element_type=jnp.float32) + b1_f)
    packed_r = jnp.dot(pooler_r, w2_f, preferred_element_type=jnp.float32) + b2_f
    cls_r = packed_r[:, :NUM_CLASSES]
    pool_r = packed_r[:, NUM_CLASSES:NUM_CLASSES + HIDDEN]
    assert jnp.allclose(pooler_output, pool_r, atol=1e-3)
    assert jnp.allclose(cls_output, cls_r, atol=1e-3)

    assert cls_output.shape == (B, NUM_CLASSES)
    assert pooler_output.shape == (B, HIDDEN)
    print("KERNEL_OK")
</pallas_src>

<mosaic_0001>
module attributes {stable_mosaic.version = 11 : i64} {
  func.func @_fused_kernel(%arg0: i32, %arg1: memref<8x1024xf32, #tpu.memory_space<vmem>>, %arg2: memref<1024x32xbf16, #tpu.memory_space<vmem>>, %arg3: memref<1x32xf32, #tpu.memory_space<vmem>>, %arg4: memref<32x128xf32, #tpu.memory_space<vmem>>, %arg5: memref<1x128xf32, #tpu.memory_space<vmem>>, %arg6: memref<8x128xf32, #tpu.memory_space<vmem>>) attributes {dimension_semantics = [#tpu.dimension_semantics<parallel>], iteration_bounds = array<i64: 1>, scalar_prefetch = 0 : i64, scratch_operands = 0 : i64, tpu.core_type = #tpu.core_type<tc>, window_params = [{transform_indices = @transform_0, window_bounds = array<i64: 8, 1024>}, {pipeline_mode = #tpu.pipeline_mode<synchronous>, transform_indices = @transform_1, window_bounds = array<i64: 1024, 32>}, {pipeline_mode = #tpu.pipeline_mode<synchronous>, transform_indices = @transform_2, window_bounds = array<i64: 1, 32>}, {pipeline_mode = #tpu.pipeline_mode<synchronous>, transform_indices = @transform_3, window_bounds = array<i64: 32, 128>}, {pipeline_mode = #tpu.pipeline_mode<synchronous>, transform_indices = @transform_4, window_bounds = array<i64: 1, 128>}, {transform_indices = @transform_5, window_bounds = array<i64: 8, 128>}]} {
    %c0 = arith.constant 0 : index
    %c0_0 = arith.constant 0 : index
    %0 = vector.load %arg1[%c0, %c0_0] : memref<8x1024xf32, #tpu.memory_space<vmem>>, vector<8x1024xf32>
    %1 = arith.truncf %0 : vector<8x1024xf32> to vector<8x1024xbf16>
    %c0_1 = arith.constant 0 : index
    %c0_2 = arith.constant 0 : index
    %2 = vector.load %arg2[%c0_1, %c0_2] : memref<1024x32xbf16, #tpu.memory_space<vmem>>, vector<1024x32xbf16>
    %cst = arith.constant dense<0.000000e+00> : vector<8x32xf32>
    %3 = tpu.matmul %1, %2, %cst {dimension_numbers = #tpu.dot_dimension_numbers<[1], [0], [0], [1], [0, 0, 1, 1], [], []>} : vector<8x1024xbf16>, vector<1024x32xbf16>, vector<8x32xf32> -> vector<8x32xf32>
    %c0_3 = arith.constant 0 : index
    %c0_4 = arith.constant 0 : index
    %4 = vector.load %arg3[%c0_3, %c0_4] : memref<1x32xf32, #tpu.memory_space<vmem>>, vector<1x32xf32>
    %5 = vector.broadcast %4 : vector<1x32xf32> to vector<8x32xf32>
    %6 = arith.addf %3, %5 : vector<8x32xf32>
    %7 = math.tanh %6 : vector<8x32xf32>
    %c0_5 = arith.constant 0 : index
    %c0_6 = arith.constant 0 : index
    %8 = vector.load %arg4[%c0_5, %c0_6] : memref<32x128xf32, #tpu.memory_space<vmem>>, vector<32x128xf32>
    %cst_7 = arith.constant dense<0.000000e+00> : vector<8x128xf32>
    %9 = tpu.matmul %7, %8, %cst_7 {dimension_numbers = #tpu.dot_dimension_numbers<[1], [0], [0], [1], [0, 0, 1, 1], [], []>} : vector<8x32xf32>, vector<32x128xf32>, vector<8x128xf32> -> vector<8x128xf32>
    %c0_8 = arith.constant 0 : index
    %c0_9 = arith.constant 0 : index
    %10 = vector.load %arg5[%c0_8, %c0_9] : memref<1x128xf32, #tpu.memory_space<vmem>>, vector<1x128xf32>
    %11 = vector.broadcast %10 : vector<1x128xf32> to vector<8x128xf32>
    %12 = arith.addf %9, %11 : vector<8x128xf32>
    %c0_10 = arith.constant 0 : index
    %c0_11 = arith.constant 0 : index
    %13 = vector.load %arg6[%c0_10, %c0_11] : memref<8x128xf32, #tpu.memory_space<vmem>>, vector<8x128xf32>
    tpu.vector_store %arg6[%c0_10, %c0_11], %12 {strides = array<i32>} : memref<8x128xf32, #tpu.memory_space<vmem>>, vector<8x128xf32>,
    return
  }
  func.func @transform_0(%arg0: i32) -> (i32, i32) {
    %c0_i32 = arith.constant 0 : i32
    %c0_i32_0 = arith.constant 0 : i32
    return %arg0, %c0_i32 : i32, i32
  }
  func.func @transform_1(%arg0: i32) -> (i32, i32) {
    %c0_i32 = arith.constant 0 : i32
    %c0_i32_0 = arith.constant 0 : i32
    %c0_i32_1 = arith.constant 0 : i32
    return %c0_i32, %c0_i32_0 : i32, i32
  }
  func.func @transform_2(%arg0: i32) -> (i32, i32) {
    %c0_i32 = arith.constant 0 : i32
    %c0_i32_0 = arith.constant 0 : i32
    %c0_i32_1 = arith.constant 0 : i32
    return %c0_i32, %c0_i32_0 : i32, i32
  }
  func.func @transform_3(%arg0: i32) -> (i32, i32) {
    %c0_i32 = arith.constant 0 : i32
    %c0_i32_0 = arith.constant 0 : i32
    %c0_i32_1 = arith.constant 0 : i32
    return %c0_i32, %c0_i32_0 : i32, i32
  }
  func.func @transform_4(%arg0: i32) -> (i32, i32) {
    %c0_i32 = arith.constant 0 : i32
    %c0_i32_0 = arith.constant 0 : i32
    %c0_i32_1 = arith.constant 0 : i32
    return %c0_i32, %c0_i32_0 : i32, i32
  }
  func.func @transform_5(%arg0: i32) -> (i32, i32) {
    %c0_i32 = arith.constant 0 : i32
    %c0_i32_0 = arith.constant 0 : i32
    return %arg0, %c0_i32 : i32, i32
  }
}

</mosaic_0001>

<bundles_post_ra>
// kernel: multicrop_wrapper_forward.1
= control target key start
LH: loop header
LB: loop body
LE: loop exit
PB: predicated region body
PF: predicated region fallthrough
CT: control target
= control target key end

     0   :  { %vm1054_vm0 = vmmov 0   ;;  %vm728_vm1 = vcmask 261120   ;;  %s1323_s1 = inlined_call_operand.vmem [shape: bf16[1024,32], index: 1, kind: input, shape index: {}]   ;;  %s1324_s0 = inlined_call_operand.vmem [shape: f32[8,1024], index: 0, kind: input, shape index: {}]   ;;  %s1325_s3 = inlined_call_operand.vmem [shape: f32[32,128], index: 3, kind: input, shape index: {}]   ;;  %s1326_s2 = inlined_call_operand.vmem [shape: f32[1,32], index: 2, kind: input, shape index: {}]   ;;  %s1327_s4 = inlined_call_operand.vmem [shape: f32[1,128], index: 4, kind: input, shape index: {}]   ;;  %s1328_s5 = inlined_call_operand.vmem [shape: f32[8,128], index: 5, kind: output, shape index: {}]  }
   0x1   :  { %v987_v0 = vld [vmem:[%s1323_s1 + $0x40] sm:$0xff]   ;;  %v991_v4 = vld [vmem:[%s1323_s1 + $0x48] sm:$0xff]   ;;  %v995_v8 = vld [vmem:[%s1323_s1 + $0x50] sm:$0xff]  }
   0x2   :  { %v988_v1 = vld [vmem:[%s1323_s1 + $0xc0] sm:$0xff]   ;;  %874 = vmatprep.subr.bf16.mxu0 %v987_v0  ;;  %v992_v5 = vld [vmem:[%s1323_s1 + $0xc8] sm:$0xff]   ;;  %v996_v9 = vld [vmem:[%s1323_s1 + $0xd0] sm:$0xff]  }
   0x3   :  { %v989_v2 = vld [vmem:[%s1323_s1] sm:$0xff]   ;;  %896 = vmatprep.subr.bf16.mxu1 %v988_v1  ;;  %v993_v6 = vld [vmem:[%s1323_s1 + $0x8] sm:$0xff]   ;;  %v997_v10 = vld [vmem:[%s1323_s1 + $0x10] sm:$0xff]  }
   0x4   :  { %v990_v3 = vld [vmem:[%s1323_s1 + $0x80] sm:$0xff]   ;;  %875 = vmatpush3.bf16.msra.mxu0 %v989_v2  ;;  %v994_v7 = vld [vmem:[%s1323_s1 + $0x88] sm:$0xff]   ;;  %v998_v11 = vld [vmem:[%s1323_s1 + $0x90] sm:$0xff]  }
   0x5   :  { %897 = vmatpush3.bf16.msra.mxu1 %v990_v3  ;;  %876 = vmatprep.subr.bf16.mxu0 %v991_v4  ;;  %v999_v12 = vld [vmem:[%s1323_s1 + $0x58] sm:$0xff]   ;;  %v1003_v16 = vld [vmem:[%s1323_s1 + $0x60] sm:$0xff]   ;;  %v1007_v20 = vld [vmem:[%s1323_s1 + $0x68] sm:$0xff]  }
   0x6   :  { %898 = vmatprep.subr.bf16.mxu1 %v992_v5  ;;  %v1000_v13 = vld [vmem:[%s1323_s1 + $0xd8] sm:$0xff]   ;;  %v1004_v17 = vld [vmem:[%s1323_s1 + $0xe0] sm:$0xff]   ;;  %v1008_v21 = vld [vmem:[%s1323_s1 + $0xe8] sm:$0xff]  }
   0x7   :  { %v1001_v14 = vld [vmem:[%s1323_s1 + $0x18] sm:$0xff]   ;;  %v1005_v18 = vld [vmem:[%s1323_s1 + $0x20] sm:$0xff]   ;;  %v1009_v22 = vld [vmem:[%s1323_s1 + $0x28] sm:$0xff]  }
   0x8   :  { %877 = vmatpush3.bf16.msra.mxu0 %v993_v6  ;;  %v1002_v15 = vld [vmem:[%s1323_s1 + $0x98] sm:$0xff]   ;;  %v1006_v19 = vld [vmem:[%s1323_s1 + $0xa0] sm:$0xff]   ;;  %v1010_v23 = vld [vmem:[%s1323_s1 + $0xa8] sm:$0xff]  }
   0x9   :  { %899 = vmatpush3.bf16.msra.mxu1 %v994_v7  ;;  %878 = vmatprep.subr.bf16.mxu0 %v995_v8  ;;  %v1011_v24 = vld [vmem:[%s1323_s1 + $0x70] sm:$0xff]   ;;  %v1015_v28 = vld [vmem:[%s1323_s1 + $0x78] sm:$0xff]   ;;  %v22_v32 = vld [vmem:[%s1324_s0 + $0x8] sm:$0xff] }
   0xa   :  { %900 = vmatprep.subr.bf16.mxu1 %v996_v9  ;;  %v1012_v25 = vld [vmem:[%s1323_s1 + $0xf0] sm:$0xff]   ;;  %v1016_v29 = vld [vmem:[%s1323_s1 + $0xf8] sm:$0xff]   ;;  %v21_v34 = vld [vmem:[%s1324_s0] sm:$0xff]  ;;  %v30_v35 = vpack.c.bf16 %v22_v32, %v22_v32 }
   0xb   :  { %v1013_v26 = vld [vmem:[%s1323_s1 + $0x30] sm:$0xff]   ;;  %v1017_v30 = vld [vmem:[%s1323_s1 + $0x38] sm:$0xff]   ;;  %v29_v37 = vpack.c.bf16 %v21_v34, %v21_v34  ;;  %v1019_v40 = vld [vmem:[%s1323_s1 + $0x140] sm:$0xff]  }
   0xc   :  { %879 = vmatpush3.bf16.msra.mxu0 %v997_v10  ;;  %v1014_v27 = vld [vmem:[%s1323_s1 + $0xb0] sm:$0xff]   ;;  %v1018_v31 = vld [vmem:[%s1323_s1 + $0xb8] sm:$0xff]   ;;  %588 = vmatprep.mubr.bf16.mxu0 %v30_v35  ;;  %v1020_v41 = vld [vmem:[%s1323_s1 + $0x1c0] sm:$0xff]  }
   0xd   :  { %901 = vmatpush3.bf16.msra.mxu1 %v998_v11  ;;  %880 = vmatprep.subr.bf16.mxu0 %v999_v12  ;;  %v24_v33 = vld [vmem:[%s1324_s0 + $0x18] sm:$0xff]  ;;  %v23_v38 = vld [vmem:[%s1324_s0 + $0x10] sm:$0xff]  ;;  %v1021_v42 = vld [vmem:[%s1323_s1 + $0x100] sm:$0xff]  }
   0xe   :  { %902 = vmatprep.subr.bf16.mxu1 %v1000_v13  ;;  %v32_v36 = vpack.c.bf16 %v24_v33, %v24_v33  ;;  %v31_v39 = vpack.c.bf16 %v23_v38, %v23_v38  ;;  %v1022_v43 = vld [vmem:[%s1323_s1 + $0x180] sm:$0xff]   ;;  %v1023_v44 = vld [vmem:[%s1323_s1 + $0x148] sm:$0xff]   ;;  %v1027_v48 = vld [vmem:[%s1323_s1 + $0x150] sm:$0xff]  }
   0xf   :  { %v1024_v45 = vld [vmem:[%s1323_s1 + $0x1c8] sm:$0xff]   ;;  %v1028_v49 = vld [vmem:[%s1323_s1 + $0x1d0] sm:$0xff]   ;;  %v1031_v52 = vld [vmem:[%s1323_s1 + $0x158] sm:$0xff]  }
  0x10   :  { %881 = vmatpush3.bf16.msra.mxu0 %v1001_v14  ;;  %628 = vmatprep.mubr.bf16.mxu1 %v32_v36  ;;  %v1025_v46 = vld [vmem:[%s1323_s1 + $0x108] sm:$0xff]   ;;  %v1029_v50 = vld [vmem:[%s1323_s1 + $0x110] sm:$0xff]   ;;  %v1032_v53 = vld [vmem:[%s1323_s1 + $0x1d8] sm:$0xff]  }
  0x11   :  { %903 = vmatpush3.bf16.msra.mxu1 %v1002_v15  ;;  %882 = vmatprep.subr.bf16.mxu0 %v1003_v16  ;;  %v1026_v47 = vld [vmem:[%s1323_s1 + $0x188] sm:$0xff]   ;;  %v1030_v51 = vld [vmem:[%s1323_s1 + $0x190] sm:$0xff]   ;;  %v1033_v54 = vld [vmem:[%s1323_s1 + $0x118] sm:$0xff]   ;;  %v1053_v16 = vmov 0.0|0.0  }
  0x12   :  { %904 = vmatprep.subr.bf16.mxu1 %v1004_v17  ;;  %v1034_v55 = vld [vmem:[%s1323_s1 + $0x198] sm:$0xff]   ;;  %v1035_v56 = vld [vmem:[%s1323_s1 + $0x160] sm:$0xff]   ;;  %v1039_v60 = vld [vmem:[%s1323_s1 + $0x168] sm:$0xff]  }
  0x13   :  { %v1036_v57 = vld [vmem:[%s1323_s1 + $0x1e0] sm:$0xff]   ;;  %v1040_v61 = vld [vmem:[%s1323_s1 + $0x1e8] sm:$0xff]   ;;  %v1043_v0 = vld [vmem:[%s1323_s1 + $0x170] sm:$0xff]  }
  0x14   :  { %883 = vmatpush3.bf16.msra.mxu0 %v1005_v18  ;;  %v1037_v58 = vld [vmem:[%s1323_s1 + $0x120] sm:$0xff]   ;;  %v1041_v62 = vld [vmem:[%s1323_s1 + $0x128] sm:$0xff]   ;;  %v1044_v1 = vld [vmem:[%s1323_s1 + $0x1f0] sm:$0xff]  }
  0x15   :  { %905 = vmatpush3.bf16.msra.mxu1 %v1006_v19  ;;  %884 = vmatprep.subr.bf16.mxu0 %v1007_v20  ;;  %v1038_v59 = vld [vmem:[%s1323_s1 + $0x1a0] sm:$0xff]   ;;  %v1042_v63 = vld [vmem:[%s1323_s1 + $0x1a8] sm:$0xff]   ;;  %v1045_v2 = vld [vmem:[%s1323_s1 + $0x130] sm:$0xff]   ;;  %v1055_v20 = vmov 0.0  }
  0x16   :  { %906 = vmatprep.subr.bf16.mxu1 %v1008_v21  ;;  %v1046_v3 = vld [vmem:[%s1323_s1 + $0x1b0] sm:$0xff]   ;;  %v1047_v4 = vld [vmem:[%s1323_s1 + $0x178] sm:$0xff]   ;;  %v26_v8 = vld [vmem:[%s1324_s0 + $0x28] sm:$0xff] }
  0x17   :  { %v1048_v5 = vld [vmem:[%s1323_s1 + $0x1f8] sm:$0xff]   ;;  %v34_v10 = vpack.c.bf16 %v26_v8, %v26_v8  ;;  %v25_v12 = vld [vmem:[%s1324_s0 + $0x20] sm:$0xff]  ;;  %v27_v13 = vld [vmem:[%s1324_s0 + $0x30] sm:$0xff] }
  0x18   :  { %885 = vmatpush3.bf16.msra.mxu0 %v1009_v22  ;;  %v1049_v6 = vld [vmem:[%s1323_s1 + $0x138] sm:$0xff]   ;;  %v33_v14 = vpack.c.bf16 %v25_v12, %v25_v12  ;;  %v35_v15 = vpack.c.bf16 %v27_v13, %v27_v13  ;;  %v717_v17 = vld [vmem:[%s1325_s3] sm:$0xff]  ;;  %v718_v18 = vld [vmem:[%s1325_s3 + $0x8] sm:$0xff] }
  0x19   :  { %907 = vmatpush3.bf16.msra.mxu1 %v1010_v23  ;;  %886 = vmatprep.subr.bf16.mxu0 %v1011_v24  ;;  %v1050_v7 = vld [vmem:[%s1323_s1 + $0x1b8] sm:$0xff]   ;;  %v719_v19 = vld [vmem:[%s1325_s3 + $0x10] sm:$0xff]  ;;  %v979_v21 = vpack.c.bf16 %v718_v18, %v717_v17 }
  0x1a   :  { %908 = vmatprep.subr.bf16.mxu1 %v1012_v25  ;;  %v28_v9 = vld [vmem:[%s1324_s0 + $0x38] sm:$0xff] }
  0x1b   :  { %v36_v11 = vpack.c.bf16 %v28_v9, %v28_v9  ;;  %v720_v22 = vld [vmem:[%s1325_s3 + $0x18] sm:$0xff] }
  0x1c   :  { %887 = vmatpush3.bf16.msra.mxu0 %v1013_v26  ;;  %v982_v23 = vpack.c.bf16 %v720_v22, %v719_v19  ;;  %v807_v26 = vld [vmem:[%s1326_s2] ss:$0 sm:$0xff] }
  0x1d   :  { %909 = vmatpush3.bf16.msra.mxu1 %v1014_v27  ;;  %888 = vmatprep.subr.bf16.mxu0 %v1015_v28 }
  0x1e   :  { %910 = vmatprep.subr.bf16.mxu1 %v1016_v29 }
  0x20   :  { %889 = vmatpush3.bf16.msra.mxu0 %v1017_v30 }
  0x21   :  { %911 = vmatpush3.bf16.msra.mxu1 %v1018_v31  ;;  %918 = vmatprep.subr.bf16.mxu0 %v1019_v40 }
  0x22   :  { %940 = vmatprep.subr.bf16.mxu1 %v1020_v41 }
  0x23   :  { %589 = vmatmul.mubr.bf16.vlgmr.msra.gmra.mrb[0].mxu0 %v29_v37 }
  0x24   :  { %629 = vmatmul.mubr.bf16.vlgmr.msra.gmra.mrb[0].mxu1 %v31_v39  ;;  %919 = vmatpush3.bf16.msra.mxu0 %v1021_v42 }
  0x25   :  { %941 = vmatpush3.bf16.msra.mxu1 %v1022_v43  ;;  %920 = vmatprep.subr.bf16.mxu0 %v1023_v44 }
  0x26   :  { %942 = vmatprep.subr.bf16.mxu1 %v1024_v45  ;;  %668 = vmatprep.mubr.bf16.mxu0 %v34_v10 }
  0x27   :  { %708 = vmatprep.mubr.bf16.mxu1 %v36_v11 }
  0x28   :  { %921 = vmatpush3.bf16.msra.mxu0 %v1025_v46 }
  0x29   :  { %943 = vmatpush3.bf16.msra.mxu1 %v1026_v47  ;;  %922 = vmatprep.subr.bf16.mxu0 %v1027_v48 }
  0x2a   :  { %944 = vmatprep.subr.bf16.mxu1 %v1028_v49 }
  0x2c   :  { %923 = vmatpush3.bf16.msra.mxu0 %v1029_v50  ;;  %v872_v50 = vld [vmem:[%s1327_s4] ss:$0 sm:$0xff] }
  0x2d   :  { %945 = vmatpush3.bf16.msra.mxu1 %v1030_v51  ;;  %924 = vmatprep.subr.bf16.mxu0 %v1031_v52 }
  0x2e   :  { %946 = vmatprep.subr.bf16.mxu1 %v1032_v53 }
  0x30   :  { %925 = vmatpush3.bf16.msra.mxu0 %v1033_v54 }
  0x31   :  { %947 = vmatpush3.bf16.msra.mxu1 %v1034_v55  ;;  %926 = vmatprep.subr.bf16.mxu0 %v1035_v56 }
  0x32   :  { %948 = vmatprep.subr.bf16.mxu1 %v1036_v57 }
  0x34   :  { %927 = vmatpush3.bf16.msra.mxu0 %v1037_v58 }
  0x35   :  { %949 = vmatpush3.bf16.msra.mxu1 %v1038_v59  ;;  %928 = vmatprep.subr.bf16.mxu0 %v1039_v60 }
  0x36   :  { %950 = vmatprep.subr.bf16.mxu1 %v1040_v61 }
  0x38   :  { %929 = vmatpush3.bf16.msra.mxu0 %v1041_v62 }
  0x39   :  { %951 = vmatpush3.bf16.msra.mxu1 %v1042_v63  ;;  %930 = vmatprep.subr.bf16.mxu0 %v1043_v0 }
  0x3a   :  { %952 = vmatprep.subr.bf16.mxu1 %v1044_v1 }
  0x3c   :  { %931 = vmatpush3.bf16.msra.mxu0 %v1045_v2 }
  0x3d   :  { %953 = vmatpush3.bf16.msra.mxu1 %v1046_v3  ;;  %932 = vmatprep.subr.bf16.mxu0 %v1047_v4 }
  0x3e   :  { %954 = vmatprep.subr.bf16.mxu1 %v1048_v5 }
  0x40   :  { %933 = vmatpush3.bf16.msra.mxu0 %v1049_v6 }
  0x41   :  { %955 = vmatpush3.bf16.msra.mxu1 %v1050_v7  ;;  %978 = vmatprep.subr.bf16.mxu0 %v1053_v16 }
  0x43   :  { %669 = vmatmul.mubr.bf16.vlgmr.msra.gmra.mrb[4].mxu0 %v33_v14 }
  0x44   :  { %709 = vmatmul.mubr.bf16.vlgmr.msra.gmra.mrb[4].mxu1 %v35_v15  ;;  %975 = vmatprep.mubr.msk.f32.mxu0 %vm1054_vm0, %v1055_v20 }
  0x45   :  { %980 = vmatpush3.bf16.msra.mxu0 %v979_v21 }
  0x46   :  { %981 = vmatprep.subr.bf16.mxu0 %v1053_v16 }
  0x49   :  { %983 = vmatpush3.bf16.msra.mxu0 %v982_v23 }
  0xf6   :  { %v890_v24 = vpop.f32.mrb[0].mxu0 }
  0xf7   :  { %v912_v25 = vpop.f32.mrb[0].mxu1  ;;  %v891_v27 = vpop.f32.mrb[1].mxu0 }
  0xf8   :  { %v913_v28 = vpop.f32.mrb[1].mxu1  ;;  %v892_v29 = vadd.f32 %v891_v27, %v890_v24  ;;  %v893_v31 = vpop.f32.mrb[2].mxu0 }
  0xf9   :  { %v914_v30 = vadd.f32 %v913_v28, %v912_v25  ;;  %v915_v32 = vpop.f32.mrb[2].mxu1  ;;  %v894_v33 = vpop.f32.mrb[3].mxu0 }
  0xfa   :  { %v916_v34 = vpop.f32.mrb[3].mxu1  ;;  %v591_v35 = vadd.f32 %v892_v29, %v807_v26 }
  0xfc   :  { %v631_v36 = vadd.f32 %v914_v30, %v591_v35 }
 0x116   :  { %v934_v37 = vpop.f32.mrb[4].mxu0 }
 0x117   :  { %v956_v38 = vpop.f32.mrb[4].mxu1  ;;  %v935_v39 = vpop.f32.mrb[5].mxu0 }
 0x118   :  { %v936_v40 = vadd.f32 %v935_v39, %v934_v37  ;;  %v957_v41 = vpop.f32.mrb[5].mxu1  ;;  %v937_v42 = vpop.f32.mrb[6].mxu0 }
 0x119   :  { %v958_v43 = vadd.f32 %v957_v41, %v956_v38  ;;  %v959_v44 = vpop.f32.mrb[6].mxu1  ;;  %v938_v45 = vpop.f32.mrb[7].mxu0 }
 0x11a   :  { %v671_v46 = vadd.f32 %v936_v40, %v631_v36  ;;  %v960_v47 = vpop.f32.mrb[7].mxu1 }
 0x11c   :  { %v711_v48 = vadd.f32 %v958_v43, %v671_v46 }
 0x11e   :  { %1051 = vtanh.f32 %v711_v48 }
 0x128   :  { %v1052_v49 = vpop.eup %1051 }
 0x129   :  { %976 = vmatmul.mubr.msk.f32.vlgmr.msra.gmra.mrb[8].mxu0 %vm728_vm1, %v1052_v49 }
 0x1fc   :  { %v798_v51 = vpop.f32.mrb[8].mxu0 }
 0x1fd   :  { %v799_v52 = vadd.f32 %v872_v50, %v798_v51  ;;  %v977_v53 = vpop.f32.mrb[9].mxu0 }
 0x1ff   :  { %802 = vst [vmem:[%s1328_s5] sm:$0xff] %v799_v52 }

</bundles_post_ra>
